<compile_context>
chip_gen: v7x
topology: tpu7x:2x2x1
jax: 0.10.0
libtpu: 0.0.40
codegen_flags: <defaults>
</compile_context>

<pallas_src>
import math

import jax
import jax.numpy as jnp
import numpy as np
from jax.experimental import pallas as pl
from jax.experimental.pallas import tpu as pltpu

LN_EPS = 1e-5  # PyTorch nn.LayerNorm default


def _layernorm(h, gamma, beta):
    mu = jnp.mean(h, axis=-1, keepdims=True)
    var = jnp.mean((h - mu) ** 2, axis=-1, keepdims=True)
    return (h - mu) * jax.lax.rsqrt(var + LN_EPS) * gamma + beta


def _gelu_exact(x):
    # nn.GELU() default = exact (erf) form
    return 0.5 * x * (1.0 + jax.lax.erf(x * (1.0 / math.sqrt(2.0))))


# --------------- kernel 1 : LayerNorm1 + fused QKV projection ----------------
def qkv_kernel(x_ref, g1_ref, be1_ref, wqkv_ref, qkv_ref):
    x = x_ref[0]                                          # (TN, C) f32
    h = _layernorm(x, g1_ref[0], be1_ref[0])              # f32 statistics
    qkv = jnp.dot(h.astype(jnp.bfloat16), wqkv_ref[...],
                  preferred_element_type=jnp.float32)     # (TN, 3C), f32 acc
    qkv_ref[0] = qkv.astype(jnp.bfloat16)


# ------ kernel 2 : attention + proj + residual + LayerNorm2 + MLP + res ------
def attn_mlp_kernel(x_ref, q_ref, k_ref, v_ref, wph_ref, bp_ref,
                    g2_ref, be2_ref, w1_ref, b1_ref, w2_ref, b2_ref, o_ref):
    x = x_ref[0]            # (TQ, C)     f32 residual stream
    q = q_ref[0]            # (H, TQ, Dh) bf16 (scale already folded into Wq)
    k = k_ref[0]            # (H, N, Dh)  bf16
    v = v_ref[0]            # (H, N, Dh)  bf16

    # head-batched attention: leading-batch einsums, f32 softmax statistics
    s = jnp.einsum("hqd,hkd->hqk", q, k, preferred_element_type=jnp.float32)
    s = s - jnp.max(s, axis=-1, keepdims=True)
    p = jnp.exp(s)
    p = p * pl.reciprocal(jnp.sum(p, axis=-1, keepdims=True), approx=True)
    a = jnp.einsum("hqk,hkd->hqd", p.astype(jnp.bfloat16), v,
                   preferred_element_type=jnp.float32)             # (H,TQ,Dh)

    # output projection as per-head matmuls summed over heads; avoids an
    # in-kernel (H,TQ,Dh) -> (TQ,H*Dh) transpose.
    pr = jnp.einsum("hqd,hdc->hqc", a.astype(jnp.bfloat16), wph_ref[...],
                    preferred_element_type=jnp.float32)            # (H,TQ,C)
    attn = jnp.sum(pr, axis=0) + bp_ref[0]                         # (TQ, C)

    x1 = x + attn                                                  # residual 1

    h2 = _layernorm(x1, g2_ref[0], be2_ref[0])
    m = jnp.dot(h2.astype(jnp.bfloat16), w1_ref[...],
                preferred_element_type=jnp.float32) + b1_ref[0]
    m = _gelu_exact(m)
    m = jnp.dot(m.astype(jnp.bfloat16), w2_ref[...],
                preferred_element_type=jnp.float32) + b2_ref[0]

    o_ref[0] = x1 + m                                              # residual 2


# ------------------------------- wrapper -------------------------------------
def _pick_tile(n, target):
    """Largest multiple of 8 that divides n and is <= target (else full n)."""
    if n <= target:
        return n
    t = target - (target % 8)
    while t >= 8:
        if n % t == 0:
            return t
        t -= 8
    return n


def _nbytes(shape, dtype):
    return int(np.prod(shape)) * jnp.dtype(dtype).itemsize


def _vmem_limit(block_bytes, temp_bytes):
    # double-buffered pipeline blocks + in-kernel temporaries + headroom,
    # clamped to 64 MiB (physical VMEM per TensorCore on v7x).
    need = int((2 * block_bytes + temp_bytes) * 1.5) + (4 << 20)
    return int(min(max(need, 32 << 20), 64 << 20))


def block_forward(x, params, *, num_heads):
    """x: (B, N, C) float32.  params: dict of weights in PyTorch layouts."""
    B, N, C = x.shape
    H = num_heads
    Dh = C // H
    scale = Dh ** (-0.5)
    Hm = params["fc1_w"].shape[0]
    f32, bf16 = jnp.float32, jnp.bfloat16

    # One-time constant transforms: fold scale into Wq, fuse QKV into a single
    # (C, 3C) operand, split the proj weight per head, cast weights to bf16.
    wqkv = jnp.concatenate(
        [(params["q_w"] * scale).T, params["k_w"].T, params["v_w"].T],
        axis=1).astype(bf16)                                   # (C, 3C)
    wp_heads = params["proj_w"].T.reshape(H, Dh, C).astype(bf16)
    w1 = params["fc1_w"].T.astype(bf16)                        # (C, Hm)
    w2 = params["fc2_w"].T.astype(bf16)                        # (Hm, C)

    def row(v):
        return v.reshape(1, -1).astype(f32)

    g1, be1 = row(params["norm1_g"]), row(params["norm1_b"])
    g2, be2 = row(params["norm2_g"]), row(params["norm2_b"])
    bp, b1, b2 = row(params["proj_b"]), row(params["fc1_b"]), row(params["fc2_b"])

    # TODO(synk): constant-index weight blocks are still double-buffered by the
    # pipeline; single-buffering them (pl.Buffered(1) / memory_space=pl.ANY +
    # one-time DMA) would halve the weight VMEM footprint on v7x.

    # -------------- call 1: LN1 + fused QKV over row tiles -------------------
    TN = _pick_tile(N, 512)
    blocks1 = [((1, TN, C), f32), ((1, C), f32), ((1, C), f32),
               ((C, 3 * C), bf16), ((1, TN, 3 * C), bf16)]
    qkv = pl.pallas_call(
        qkv_kernel,
        out_shape=jax.ShapeDtypeStruct((B, N, 3 * C), bf16),
        grid_spec=pltpu.PrefetchScalarGridSpec(
            num_scalar_prefetch=0,
            grid=(B, N // TN),
            in_specs=[
                pl.BlockSpec((1, TN, C), lambda b, i: (b, i, 0)),
                pl.BlockSpec((1, C), lambda b, i: (0, 0)),
                pl.BlockSpec((1, C), lambda b, i: (0, 0)),
                pl.BlockSpec((C, 3 * C), lambda b, i: (0, 0)),
            ],
            out_specs=pl.BlockSpec((1, TN, 3 * C), lambda b, i: (b, i, 0)),
        ),
        compiler_params=pltpu.CompilerParams(
            dimension_semantics=("parallel", "parallel"),
            vmem_limit_bytes=_vmem_limit(
                sum(_nbytes(s, d) for s, d in blocks1),
                _nbytes((TN, 3 * C), f32)),
        ),
    )(x, g1, be1, wqkv)

    # Head split in plain XLA (layout plumbing outside the kernels).
    q, k, v = jnp.split(qkv, 3, axis=-1)

    def to_heads(t):
        return t.reshape(B, N, H, Dh).transpose(0, 2, 1, 3)    # (B, H, N, Dh)

    qh, kh, vh = to_heads(q), to_heads(k), to_heads(v)

    # ------ call 2: attention + proj + residual + LN2 + MLP + residual -------
    TQ = _pick_tile(N, 256)
    blocks2 = [((1, TQ, C), f32), ((1, H, TQ, Dh), bf16),
               ((1, H, N, Dh), bf16), ((1, H, N, Dh), bf16),
               ((H, Dh, C), bf16), ((1, C), f32), ((1, C), f32), ((1, C), f32),
               ((C, Hm), bf16), ((1, Hm), f32), ((Hm, C), bf16), ((1, C), f32),
               ((1, TQ, C), f32)]
    temps2 = (2 * _nbytes((H, TQ, N), f32)       # scores + probs
              + _nbytes((H, TQ, C), f32)         # per-head projection
              + _nbytes((TQ, Hm), f32))          # MLP hidden

    out = pl.pallas_call(
        attn_mlp_kernel,
        out_shape=jax.ShapeDtypeStruct((B, N, C), f32),
        grid_spec=pltpu.PrefetchScalarGridSpec(
            num_scalar_prefetch=0,
            grid=(B, N // TQ),
            in_specs=[
                pl.BlockSpec((1, TQ, C), lambda b, i: (b, i, 0)),          # x
                pl.BlockSpec((1, H, TQ, Dh), lambda b, i: (b, 0, i, 0)),   # q
                pl.BlockSpec((1, H, N, Dh), lambda b, i: (b, 0, 0, 0)),    # k
                pl.BlockSpec((1, H, N, Dh), lambda b, i: (b, 0, 0, 0)),    # v
                pl.BlockSpec((H, Dh, C), lambda b, i: (0, 0, 0)),          # Wp
                pl.BlockSpec((1, C), lambda b, i: (0, 0)),                 # bp
                pl.BlockSpec((1, C), lambda b, i: (0, 0)),                 # g2
                pl.BlockSpec((1, C), lambda b, i: (0, 0)),                 # be2
                pl.BlockSpec((C, Hm), lambda b, i: (0, 0)),                # w1
                pl.BlockSpec((1, Hm), lambda b, i: (0, 0)),                # b1
                pl.BlockSpec((Hm, C), lambda b, i: (0, 0)),                # w2
                pl.BlockSpec((1, C), lambda b, i: (0, 0)),                 # b2
            ],
            out_specs=pl.BlockSpec((1, TQ, C), lambda b, i: (b, i, 0)),
        ),
        compiler_params=pltpu.CompilerParams(
            dimension_semantics=("parallel", "parallel"),
            vmem_limit_bytes=_vmem_limit(
                sum(_nbytes(s, d) for s, d in blocks2), temps2),
        ),
    )(x, qh, kh, vh, wp_heads, bp, g2, be2, w1, b1, w2, b2)

    return out


# ----------------------------- pure-JAX reference ----------------------------
def block_reference(x, params, num_heads):
    """Pure-JAX f32 reference reproducing the PyTorch forward pass."""
    B, N, C = x.shape
    head_dim = C // num_heads
    scale = head_dim ** (-0.5)

    def ln(h, g, b):
        mu = jnp.mean(h, axis=-1, keepdims=True)
        var = jnp.mean((h - mu) ** 2, axis=-1, keepdims=True)
        return (h - mu) / jnp.sqrt(var + LN_EPS) * g + b

    h = ln(x, params["norm1_g"], params["norm1_b"])
    q = h @ params["q_w"].T * scale
    k = h @ params["k_w"].T
    v = h @ params["v_w"].T

    def heads(t):
        return t.reshape(B, N, num_heads, head_dim).transpose(0, 2, 1, 3)

    qh, kh, vh = heads(q), heads(k), heads(v)
    s = jnp.einsum("bhnd,bhmd->bhnm", qh, kh)
    p = jax.nn.softmax(s, axis=-1)
    a = jnp.einsum("bhnm,bhmd->bhnd", p, vh)
    a = a.transpose(0, 2, 1, 3).reshape(B, N, C)
    attn = a @ params["proj_w"].T + params["proj_b"]
    x1 = x + attn

    h2 = ln(x1, params["norm2_g"], params["norm2_b"])
    m = jax.nn.gelu(h2 @ params["fc1_w"].T + params["fc1_b"], approximate=False)
    m = m @ params["fc2_w"].T + params["fc2_b"]
    return x1 + m


def init_params(key, dim, num_heads, mlp_ratio=4.0):
    mlp_hidden = int(dim * mlp_ratio)
    ks = jax.random.split(key, 8)
    std = 0.02

    def w(k, shape):
        return (std * jax.random.normal(k, shape)).astype(jnp.float32)

    return {
        "norm1_g": jnp.ones((dim,), jnp.float32),
        "norm1_b": jnp.zeros((dim,), jnp.float32),
        # PyTorch nn.Linear weight layout: (out_features, in_features)
        "q_w": w(ks[0], (dim, dim)),
        "k_w": w(ks[1], (dim, dim)),
        "v_w": w(ks[2], (dim, dim)),
        "proj_w": w(ks[3], (dim, dim)),
        "proj_b": w(ks[4], (dim,)),
        "norm2_g": jnp.ones((dim,), jnp.float32),
        "norm2_b": jnp.zeros((dim,), jnp.float32),
        "fc1_w": w(ks[5], (mlp_hidden, dim)),
        "fc1_b": w(ks[6], (mlp_hidden,)),
        "fc2_w": w(ks[7], (dim, mlp_hidden)),
        "fc2_b": jnp.zeros((dim,), jnp.float32),
    }


if __name__ == "__main__":
    B, N, dim, num_heads = 2, 8, 32, 4

    key = jax.random.PRNGKey(0)
    kx, kp = jax.random.split(key)
    x = jax.random.normal(kx, (B, N, dim), dtype=jnp.float32)
    params = init_params(kp, dim, num_heads)

    fwd = jax.jit(block_forward, static_argnames=("num_heads",))
    out = jax.block_until_ready(fwd(x, params, num_heads=num_heads))

    ref = jax.block_until_ready(block_reference(x, params, num_heads))
    # bf16 MXU operands with f32 accumulation -> relaxed tolerance vs f32 ref.
    np.testing.assert_allclose(np.asarray(out), np.asarray(ref),
                               rtol=2e-2, atol=2e-2)
    print("KERNEL_OK")
</pallas_src>

<mosaic_0001>
module attributes {stable_mosaic.version = 11 : i64} {
  func.func @qkv_kernel(%arg0: i32, %arg1: i32, %arg2: memref<1x8x32xf32, #tpu.memory_space<vmem>>, %arg3: memref<1x32xf32, #tpu.memory_space<vmem>>, %arg4: memref<1x32xf32, #tpu.memory_space<vmem>>, %arg5: memref<32x96xbf16, #tpu.memory_space<vmem>>, %arg6: memref<1x8x96xbf16, #tpu.memory_space<vmem>>) attributes {dimension_semantics = [#tpu.dimension_semantics<parallel>, #tpu.dimension_semantics<parallel>], iteration_bounds = array<i64: 2, 1>, scalar_prefetch = 0 : i64, scratch_operands = 0 : i64, tpu.core_type = #tpu.core_type<tc>, window_params = [{transform_indices = @transform_0, window_bounds = array<i64: 1, 8, 32>}, {pipeline_mode = #tpu.pipeline_mode<synchronous>, transform_indices = @transform_1, window_bounds = array<i64: 1, 32>}, {pipeline_mode = #tpu.pipeline_mode<synchronous>, transform_indices = @transform_2, window_bounds = array<i64: 1, 32>}, {pipeline_mode = #tpu.pipeline_mode<synchronous>, transform_indices = @transform_3, window_bounds = array<i64: 32, 96>}, {transform_indices = @transform_4, window_bounds = array<i64: 1, 8, 96>}]} {
    %c0 = arith.constant 0 : index
    %c0_0 = arith.constant 0 : index
    %c0_1 = arith.constant 0 : index
    %0 = vector.load %arg2[%c0, %c0_0, %c0_1] : memref<1x8x32xf32, #tpu.memory_space<vmem>>, vector<1x8x32xf32>
    %1 = vector.shape_cast %0 : vector<1x8x32xf32> to vector<8x32xf32>
    %c0_2 = arith.constant 0 : index
    %c0_3 = arith.constant 0 : index
    %2 = vector.load %arg3[%c0_2, %c0_3] : memref<1x32xf32, #tpu.memory_space<vmem>>, vector<1x32xf32>
    %3 = vector.shape_cast %2 : vector<1x32xf32> to vector<32xf32>
    %c0_4 = arith.constant 0 : index
    %c0_5 = arith.constant 0 : index
    %4 = vector.load %arg4[%c0_4, %c0_5] : memref<1x32xf32, #tpu.memory_space<vmem>>, vector<1x32xf32>
    %5 = vector.shape_cast %4 : vector<1x32xf32> to vector<32xf32>
    %cst = arith.constant dense<0.000000e+00> : vector<8xf32>
    %6 = vector.multi_reduction <add>, %1, %cst [1] : vector<8x32xf32> to vector<8xf32>
    %7 = vector.shape_cast %6 : vector<8xf32> to vector<8x1xf32>
    %cst_6 = arith.constant 3.200000e+01 : f32
    %8 = vector.broadcast %cst_6 : f32 to vector<8x1xf32>
    %9 = arith.divf %7, %8 : vector<8x1xf32>
    %10 = vector.broadcast %9 : vector<8x1xf32> to vector<8x32xf32>
    %11 = arith.subf %1, %10 : vector<8x32xf32>
    %12 = arith.mulf %11, %11 : vector<8x32xf32>
    %cst_7 = arith.constant dense<0.000000e+00> : vector<8xf32>
    %13 = vector.multi_reduction <add>, %12, %cst_7 [1] : vector<8x32xf32> to vector<8xf32>
    %14 = vector.shape_cast %13 : vector<8xf32> to vector<8x1xf32>
    %cst_8 = arith.constant 3.200000e+01 : f32
    %15 = vector.broadcast %cst_8 : f32 to vector<8x1xf32>
    %16 = arith.divf %14, %15 : vector<8x1xf32>
    %17 = vector.broadcast %9 : vector<8x1xf32> to vector<8x32xf32>
    %18 = arith.subf %1, %17 : vector<8x32xf32>
    %cst_9 = arith.constant 9.99999974E-6 : f32
    %19 = vector.broadcast %cst_9 : f32 to vector<8x1xf32>
    %20 = arith.addf %16, %19 : vector<8x1xf32>
    %21 = math.rsqrt %20 : vector<8x1xf32>
    %22 = vector.broadcast %21 : vector<8x1xf32> to vector<8x32xf32>
    %23 = arith.mulf %18, %22 : vector<8x32xf32>
    %24 = vector.shape_cast %3 : vector<32xf32> to vector<1x32xf32>
    %25 = vector.broadcast %24 : vector<1x32xf32> to vector<8x32xf32>
    %26 = arith.mulf %23, %25 : vector<8x32xf32>
    %27 = vector.shape_cast %5 : vector<32xf32> to vector<1x32xf32>
    %28 = vector.broadcast %27 : vector<1x32xf32> to vector<8x32xf32>
    %29 = arith.addf %26, %28 : vector<8x32xf32>
    %30 = arith.truncf %29 : vector<8x32xf32> to vector<8x32xbf16>
    %c0_10 = arith.constant 0 : index
    %c0_11 = arith.constant 0 : index
    %31 = vector.load %arg5[%c0_10, %c0_11] : memref<32x96xbf16, #tpu.memory_space<vmem>>, vector<32x96xbf16>
    %cst_12 = arith.constant dense<0.000000e+00> : vector<8x96xf32>
    %32 = tpu.matmul %30, %31, %cst_12 {dimension_numbers = #tpu.dot_dimension_numbers<[1], [0], [0], [1], [0, 0, 1, 1], [], []>} : vector<8x32xbf16>, vector<32x96xbf16>, vector<8x96xf32> -> vector<8x96xf32>
    %33 = arith.truncf %32 : vector<8x96xf32> to vector<8x96xbf16>
    %c0_13 = arith.constant 0 : index
    %c0_14 = arith.constant 0 : index
    %c0_15 = arith.constant 0 : index
    %34 = vector.load %arg6[%c0_13, %c0_14, %c0_15] : memref<1x8x96xbf16, #tpu.memory_space<vmem>>, vector<1x8x96xbf16>
    %35 = vector.shape_cast %34 : vector<1x8x96xbf16> to vector<8x96xbf16>
    %36 = vector.shape_cast %33 : vector<8x96xbf16> to vector<1x8x96xbf16>
    tpu.vector_store %arg6[%c0_13, %c0_14, %c0_15], %36 {strides = array<i32>} : memref<1x8x96xbf16, #tpu.memory_space<vmem>>, vector<1x8x96xbf16>,
    return
  }
  func.func @transform_0(%arg0: i32, %arg1: i32) -> (i32, i32, i32) {
    %c0_i32 = arith.constant 0 : i32
    %c0_i32_0 = arith.constant 0 : i32
    return %arg0, %arg1, %c0_i32 : i32, i32, i32
  }
  func.func @transform_1(%arg0: i32, %arg1: i32) -> (i32, i32) {
    %c0_i32 = arith.constant 0 : i32
    %c0_i32_0 = arith.constant 0 : i32
    %c0_i32_1 = arith.constant 0 : i32
    return %c0_i32, %c0_i32_0 : i32, i32
  }
  func.func @transform_2(%arg0: i32, %arg1: i32) -> (i32, i32) {
    %c0_i32 = arith.constant 0 : i32
    %c0_i32_0 = arith.constant 0 : i32
    %c0_i32_1 = arith.constant 0 : i32
    return %c0_i32, %c0_i32_0 : i32, i32
  }
  func.func @transform_3(%arg0: i32, %arg1: i32) -> (i32, i32) {
    %c0_i32 = arith.constant 0 : i32
    %c0_i32_0 = arith.constant 0 : i32
    %c0_i32_1 = arith.constant 0 : i32
    return %c0_i32, %c0_i32_0 : i32, i32
  }
  func.func @transform_4(%arg0: i32, %arg1: i32) -> (i32, i32, i32) {
    %c0_i32 = arith.constant 0 : i32
    %c0_i32_0 = arith.constant 0 : i32
    return %arg0, %arg1, %c0_i32 : i32, i32, i32
  }
}

module attributes {stable_mosaic.version = 11 : i64} {
  func.func @attn_mlp_kernel(%arg0: i32, %arg1: i32, %arg2: memref<1x8x32xf32, #tpu.memory_space<vmem>>, %arg3: memref<1x4x8x8xbf16, #tpu.memory_space<vmem>>, %arg4: memref<1x4x8x8xbf16, #tpu.memory_space<vmem>>, %arg5: memref<1x4x8x8xbf16, #tpu.memory_space<vmem>>, %arg6: memref<4x8x32xbf16, #tpu.memory_space<vmem>>, %arg7: memref<1x32xf32, #tpu.memory_space<vmem>>, %arg8: memref<1x32xf32, #tpu.memory_space<vmem>>, %arg9: memref<1x32xf32, #tpu.memory_space<vmem>>, %arg10: memref<32x128xbf16, #tpu.memory_space<vmem>>, %arg11: memref<1x128xf32, #tpu.memory_space<vmem>>, %arg12: memref<128x32xbf16, #tpu.memory_space<vmem>>, %arg13: memref<1x32xf32, #tpu.memory_space<vmem>>, %arg14: memref<1x8x32xf32, #tpu.memory_space<vmem>>) attributes {dimension_semantics = [#tpu.dimension_semantics<parallel>, #tpu.dimension_semantics<parallel>], iteration_bounds = array<i64: 2, 1>, scalar_prefetch = 0 : i64, scratch_operands = 0 : i64, tpu.core_type = #tpu.core_type<tc>, window_params = [{transform_indices = @transform_0, window_bounds = array<i64: 1, 8, 32>}, {transform_indices = @transform_1, window_bounds = array<i64: 1, 4, 8, 8>}, {transform_indices = @transform_2, window_bounds = array<i64: 1, 4, 8, 8>}, {transform_indices = @transform_3, window_bounds = array<i64: 1, 4, 8, 8>}, {pipeline_mode = #tpu.pipeline_mode<synchronous>, transform_indices = @transform_4, window_bounds = array<i64: 4, 8, 32>}, {pipeline_mode = #tpu.pipeline_mode<synchronous>, transform_indices = @transform_5, window_bounds = array<i64: 1, 32>}, {pipeline_mode = #tpu.pipeline_mode<synchronous>, transform_indices = @transform_6, window_bounds = array<i64: 1, 32>}, {pipeline_mode = #tpu.pipeline_mode<synchronous>, transform_indices = @transform_7, window_bounds = array<i64: 1, 32>}, {pipeline_mode = #tpu.pipeline_mode<synchronous>, transform_indices = @transform_8, window_bounds = array<i64: 32, 128>}, {pipeline_mode = #tpu.pipeline_mode<synchronous>, transform_indices = @transform_9, window_bounds = array<i64: 1, 128>}, {pipeline_mode = #tpu.pipeline_mode<synchronous>, transform_indices = @transform_10, window_bounds = array<i64: 128, 32>}, {pipeline_mode = #tpu.pipeline_mode<synchronous>, transform_indices = @transform_11, window_bounds = array<i64: 1, 32>}, {transform_indices = @transform_12, window_bounds = array<i64: 1, 8, 32>}]} {
    %c0 = arith.constant 0 : index
    %c0_0 = arith.constant 0 : index
    %c0_1 = arith.constant 0 : index
    %0 = vector.load %arg2[%c0, %c0_0, %c0_1] : memref<1x8x32xf32, #tpu.memory_space<vmem>>, vector<1x8x32xf32>
    %1 = vector.shape_cast %0 : vector<1x8x32xf32> to vector<8x32xf32>
    %c0_2 = arith.constant 0 : index
    %c0_3 = arith.constant 0 : index
    %c0_4 = arith.constant 0 : index
    %c0_5 = arith.constant 0 : index
    %2 = vector.load %arg3[%c0_2, %c0_3, %c0_4, %c0_5] : memref<1x4x8x8xbf16, #tpu.memory_space<vmem>>, vector<1x4x8x8xbf16>
    %3 = vector.shape_cast %2 : vector<1x4x8x8xbf16> to vector<4x8x8xbf16>
    %c0_6 = arith.constant 0 : index
    %c0_7 = arith.constant 0 : index
    %c0_8 = arith.constant 0 : index
    %c0_9 = arith.constant 0 : index
    %4 = vector.load %arg4[%c0_6, %c0_7, %c0_8, %c0_9] : memref<1x4x8x8xbf16, #tpu.memory_space<vmem>>, vector<1x4x8x8xbf16>
    %5 = vector.shape_cast %4 : vector<1x4x8x8xbf16> to vector<4x8x8xbf16>
    %c0_10 = arith.constant 0 : index
    %c0_11 = arith.constant 0 : index
    %c0_12 = arith.constant 0 : index
    %c0_13 = arith.constant 0 : index
    %6 = vector.load %arg5[%c0_10, %c0_11, %c0_12, %c0_13] : memref<1x4x8x8xbf16, #tpu.memory_space<vmem>>, vector<1x4x8x8xbf16>
    %7 = vector.shape_cast %6 : vector<1x4x8x8xbf16> to vector<4x8x8xbf16>
    "tpu.trace_start"() <{level = 10 : i32, message = "hqd,hkd->hqk"}> : () -> ()
    %cst = arith.constant dense<0.000000e+00> : vector<4x8x8xf32>
    %8 = tpu.matmul %3, %5, %cst {dimension_numbers = #tpu.dot_dimension_numbers<[2], [2], [1], [1], [0, 0, 0, 1, 1, 1], [0], [0]>} : vector<4x8x8xbf16>, vector<4x8x8xbf16>, vector<4x8x8xf32> -> vector<4x8x8xf32>
    "tpu.trace_stop"() : () -> ()
    %cst_14 = arith.constant dense<0xFF800000> : vector<4x8xf32>
    %9 = vector.multi_reduction <maximumf>, %8, %cst_14 [2] : vector<4x8x8xf32> to vector<4x8xf32>
    %10 = vector.shape_cast %9 : vector<4x8xf32> to vector<4x8x1xf32>
    %11 = vector.broadcast %10 : vector<4x8x1xf32> to vector<4x8x8xf32>
    %12 = arith.subf %8, %11 : vector<4x8x8xf32>
    %13 = math.exp %12 : vector<4x8x8xf32>
    %cst_15 = arith.constant dense<0.000000e+00> : vector<4x8xf32>
    %14 = vector.multi_reduction <add>, %13, %cst_15 [2] : vector<4x8x8xf32> to vector<4x8xf32>
    %15 = vector.shape_cast %14 : vector<4x8xf32> to vector<4x8x1xf32>
    %16 = tpu.reciprocal %15 {approx = true} : vector<4x8x1xf32> -> vector<4x8x1xf32>
    %17 = vector.broadcast %16 : vector<4x8x1xf32> to vector<4x8x8xf32>
    %18 = arith.mulf %13, %17 : vector<4x8x8xf32>
    %19 = arith.truncf %18 : vector<4x8x8xf32> to vector<4x8x8xbf16>
    "tpu.trace_start"() <{level = 10 : i32, message = "hqk,hkd->hqd"}> : () -> ()
    %cst_16 = arith.constant dense<0.000000e+00> : vector<4x8x8xf32>
    %20 = tpu.matmul %19, %7, %cst_16 {dimension_numbers = #tpu.dot_dimension_numbers<[2], [1], [1], [2], [0, 0, 0, 1, 1, 2], [0], [0]>} : vector<4x8x8xbf16>, vector<4x8x8xbf16>, vector<4x8x8xf32> -> vector<4x8x8xf32>
    "tpu.trace_stop"() : () -> ()
    %21 = arith.truncf %20 : vector<4x8x8xf32> to vector<4x8x8xbf16>
    %c0_17 = arith.constant 0 : index
    %c0_18 = arith.constant 0 : index
    %c0_19 = arith.constant 0 : index
    %22 = vector.load %arg6[%c0_17, %c0_18, %c0_19] : memref<4x8x32xbf16, #tpu.memory_space<vmem>>, vector<4x8x32xbf16>
    "tpu.trace_start"() <{level = 10 : i32, message = "hqd,hdc->hqc"}> : () -> ()
    %cst_20 = arith.constant dense<0.000000e+00> : vector<4x8x32xf32>
    %23 = tpu.matmul %21, %22, %cst_20 {dimension_numbers = #tpu.dot_dimension_numbers<[2], [1], [1], [2], [0, 0, 0, 1, 1, 2], [0], [0]>} : vector<4x8x8xbf16>, vector<4x8x32xbf16>, vector<4x8x32xf32> -> vector<4x8x32xf32>
    "tpu.trace_stop"() : () -> ()
    %cst_21 = arith.constant dense<0.000000e+00> : vector<8x32xf32>
    %24 = vector.multi_reduction <add>, %23, %cst_21 [0] : vector<4x8x32xf32> to vector<8x32xf32>
    %c0_22 = arith.constant 0 : index
    %c0_23 = arith.constant 0 : index
    %25 = vector.load %arg7[%c0_22, %c0_23] : memref<1x32xf32, #tpu.memory_space<vmem>>, vector<1x32xf32>
    %26 = vector.shape_cast %25 : vector<1x32xf32> to vector<32xf32>
    %27 = vector.shape_cast %26 : vector<32xf32> to vector<1x32xf32>
    %28 = vector.broadcast %27 : vector<1x32xf32> to vector<8x32xf32>
    %29 = arith.addf %24, %28 : vector<8x32xf32>
    %30 = arith.addf %1, %29 : vector<8x32xf32>
    %c0_24 = arith.constant 0 : index
    %c0_25 = arith.constant 0 : index
    %31 = vector.load %arg8[%c0_24, %c0_25] : memref<1x32xf32, #tpu.memory_space<vmem>>, vector<1x32xf32>
    %32 = vector.shape_cast %31 : vector<1x32xf32> to vector<32xf32>
    %c0_26 = arith.constant 0 : index
    %c0_27 = arith.constant 0 : index
    %33 = vector.load %arg9[%c0_26, %c0_27] : memref<1x32xf32, #tpu.memory_space<vmem>>, vector<1x32xf32>
    %34 = vector.shape_cast %33 : vector<1x32xf32> to vector<32xf32>
    %cst_28 = arith.constant dense<0.000000e+00> : vector<8xf32>
    %35 = vector.multi_reduction <add>, %30, %cst_28 [1] : vector<8x32xf32> to vector<8xf32>
    %36 = vector.shape_cast %35 : vector<8xf32> to vector<8x1xf32>
    %cst_29 = arith.constant 3.200000e+01 : f32
    %37 = vector.broadcast %cst_29 : f32 to vector<8x1xf32>
    %38 = arith.divf %36, %37 : vector<8x1xf32>
    %39 = vector.broadcast %38 : vector<8x1xf32> to vector<8x32xf32>
    %40 = arith.subf %30, %39 : vector<8x32xf32>
    %41 = arith.mulf %40, %40 : vector<8x32xf32>
    %cst_30 = arith.constant dense<0.000000e+00> : vector<8xf32>
    %42 = vector.multi_reduction <add>, %41, %cst_30 [1] : vector<8x32xf32> to vector<8xf32>
    %43 = vector.shape_cast %42 : vector<8xf32> to vector<8x1xf32>
    %cst_31 = arith.constant 3.200000e+01 : f32
    %44 = vector.broadcast %cst_31 : f32 to vector<8x1xf32>
    %45 = arith.divf %43, %44 : vector<8x1xf32>
    %46 = vector.broadcast %38 : vector<8x1xf32> to vector<8x32xf32>
    %47 = arith.subf %30, %46 : vector<8x32xf32>
    %cst_32 = arith.constant 9.99999974E-6 : f32
    %48 = vector.broadcast %cst_32 : f32 to vector<8x1xf32>
    %49 = arith.addf %45, %48 : vector<8x1xf32>
    %50 = math.rsqrt %49 : vector<8x1xf32>
    %51 = vector.broadcast %50 : vector<8x1xf32> to vector<8x32xf32>
    %52 = arith.mulf %47, %51 : vector<8x32xf32>
    %53 = vector.shape_cast %32 : vector<32xf32> to vector<1x32xf32>
    %54 = vector.broadcast %53 : vector<1x32xf32> to vector<8x32xf32>
    %55 = arith.mulf %52, %54 : vector<8x32xf32>
    %56 = vector.shape_cast %34 : vector<32xf32> to vector<1x32xf32>
    %57 = vector.broadcast %56 : vector<1x32xf32> to vector<8x32xf32>
    %58 = arith.addf %55, %57 : vector<8x32xf32>
    %59 = arith.truncf %58 : vector<8x32xf32> to vector<8x32xbf16>
    %c0_33 = arith.constant 0 : index
    %c0_34 = arith.constant 0 : index
    %60 = vector.load %arg10[%c0_33, %c0_34] : memref<32x128xbf16, #tpu.memory_space<vmem>>, vector<32x128xbf16>
    %cst_35 = arith.constant dense<0.000000e+00> : vector<8x128xf32>
    %61 = tpu.matmul %59, %60, %cst_35 {dimension_numbers = #tpu.dot_dimension_numbers<[1], [0], [0], [1], [0, 0, 1, 1], [], []>} : vector<8x32xbf16>, vector<32x128xbf16>, vector<8x128xf32> -> vector<8x128xf32>
    %c0_36 = arith.constant 0 : index
    %c0_37 = arith.constant 0 : index
    %62 = vector.load %arg11[%c0_36, %c0_37] : memref<1x128xf32, #tpu.memory_space<vmem>>, vector<1x128xf32>
    %63 = vector.shape_cast %62 : vector<1x128xf32> to vector<128xf32>
    %64 = vector.shape_cast %63 : vector<128xf32> to vector<1x128xf32>
    %65 = vector.broadcast %64 : vector<1x128xf32> to vector<8x128xf32>
    %66 = arith.addf %61, %65 : vector<8x128xf32>
    %cst_38 = arith.constant 5.000000e-01 : f32
    %67 = vector.broadcast %cst_38 : f32 to vector<8x128xf32>
    %68 = arith.mulf %67, %66 : vector<8x128xf32>
    %cst_39 = arith.constant 0.707106769 : f32
    %69 = vector.broadcast %cst_39 : f32 to vector<8x128xf32>
    %70 = arith.mulf %66, %69 : vector<8x128xf32>
    %71 = math.erf %70 : vector<8x128xf32>
    %cst_40 = arith.constant 1.000000e+00 : f32
    %72 = vector.broadcast %cst_40 : f32 to vector<8x128xf32>
    %73 = arith.addf %72, %71 : vector<8x128xf32>
    %74 = arith.mulf %68, %73 : vector<8x128xf32>
    %75 = arith.truncf %74 : vector<8x128xf32> to vector<8x128xbf16>
    %c0_41 = arith.constant 0 : index
    %c0_42 = arith.constant 0 : index
    %76 = vector.load %arg12[%c0_41, %c0_42] : memref<128x32xbf16, #tpu.memory_space<vmem>>, vector<128x32xbf16>
    %cst_43 = arith.constant dense<0.000000e+00> : vector<8x32xf32>
    %77 = tpu.matmul %75, %76, %cst_43 {dimension_numbers = #tpu.dot_dimension_numbers<[1], [0], [0], [1], [0, 0, 1, 1], [], []>} : vector<8x128xbf16>, vector<128x32xbf16>, vector<8x32xf32> -> vector<8x32xf32>
    %c0_44 = arith.constant 0 : index
    %c0_45 = arith.constant 0 : index
    %78 = vector.load %arg13[%c0_44, %c0_45] : memref<1x32xf32, #tpu.memory_space<vmem>>, vector<1x32xf32>
    %79 = vector.shape_cast %78 : vector<1x32xf32> to vector<32xf32>
    %80 = vector.shape_cast %79 : vector<32xf32> to vector<1x32xf32>
    %81 = vector.broadcast %80 : vector<1x32xf32> to vector<8x32xf32>
    %82 = arith.addf %77, %81 : vector<8x32xf32>
    %83 = arith.addf %30, %82 : vector<8x32xf32>
    %c0_46 = arith.constant 0 : index
    %c0_47 = arith.constant 0 : index
    %c0_48 = arith.constant 0 : index
    %84 = vector.load %arg14[%c0_46, %c0_47, %c0_48] : memref<1x8x32xf32, #tpu.memory_space<vmem>>, vector<1x8x32xf32>
    %85 = vector.shape_cast %84 : vector<1x8x32xf32> to vector<8x32xf32>
    %86 = vector.shape_cast %83 : vector<8x32xf32> to vector<1x8x32xf32>
    tpu.vector_store %arg14[%c0_46, %c0_47, %c0_48], %86 {strides = array<i32>} : memref<1x8x32xf32, #tpu.memory_space<vmem>>, vector<1x8x32xf32>,
    return
  }
  func.func @transform_0(%arg0: i32, %arg1: i32) -> (i32, i32, i32) {
    %c0_i32 = arith.constant 0 : i32
    %c0_i32_0 = arith.constant 0 : i32
    return %arg0, %arg1, %c0_i32 : i32, i32, i32
  }
  func.func @transform_1(%arg0: i32, %arg1: i32) -> (i32, i32, i32, i32) {
    %c0_i32 = arith.constant 0 : i32
    %c0_i32_0 = arith.constant 0 : i32
    %c0_i32_1 = arith.constant 0 : i32
    return %arg0, %c0_i32, %arg1, %c0_i32_0 : i32, i32, i32, i32
  }
  func.func @transform_2(%arg0: i32, %arg1: i32) -> (i32, i32, i32, i32) {
    %c0_i32 = arith.constant 0 : i32
    %c0_i32_0 = arith.constant 0 : i32
    %c0_i32_1 = arith.constant 0 : i32
    %c0_i32_2 = arith.constant 0 : i32
    return %arg0, %c0_i32, %c0_i32_0, %c0_i32_1 : i32, i32, i32, i32
  }
  func.func @transform_3(%arg0: i32, %arg1: i32) -> (i32, i32, i32, i32) {
    %c0_i32 = arith.constant 0 : i32
    %c0_i32_0 = arith.constant 0 : i32
    %c0_i32_1 = arith.constant 0 : i32
    %c0_i32_2 = arith.constant 0 : i32
    return %arg0, %c0_i32, %c0_i32_0, %c0_i32_1 : i32, i32, i32, i32
  }
  func.func @transform_4(%arg0: i32, %arg1: i32) -> (i32, i32, i32) {
    %c0_i32 = arith.constant 0 : i32
    %c0_i32_0 = arith.constant 0 : i32
    %c0_i32_1 = arith.constant 0 : i32
    %c0_i32_2 = arith.constant 0 : i32
    return %c0_i32, %c0_i32_0, %c0_i32_1 : i32, i32, i32
  }
  func.func @transform_5(%arg0: i32, %arg1: i32) -> (i32, i32) {
    %c0_i32 = arith.constant 0 : i32
    %c0_i32_0 = arith.constant 0 : i32
    %c0_i32_1 = arith.constant 0 : i32
    return %c0_i32, %c0_i32_0 : i32, i32
  }
  func.func @transform_6(%arg0: i32, %arg1: i32) -> (i32, i32) {
    %c0_i32 = arith.constant 0 : i32
    %c0_i32_0 = arith.constant 0 : i32
    %c0_i32_1 = arith.constant 0 : i32
    return %c0_i32, %c0_i32_0 : i32, i32
  }
  func.func @transform_7(%arg0: i32, %arg1: i32) -> (i32, i32) {
    %c0_i32 = arith.constant 0 : i32
    %c0_i32_0 = arith.constant 0 : i32
    %c0_i32_1 = arith.constant 0 : i32
    return %c0_i32, %c0_i32_0 : i32, i32
  }
  func.func @transform_8(%arg0: i32, %arg1: i32) -> (i32, i32) {
    %c0_i32 = arith.constant 0 : i32
    %c0_i32_0 = arith.constant 0 : i32
    %c0_i32_1 = arith.constant 0 : i32
    return %c0_i32, %c0_i32_0 : i32, i32
  }
  func.func @transform_9(%arg0: i32, %arg1: i32) -> (i32, i32) {
    %c0_i32 = arith.constant 0 : i32
    %c0_i32_0 = arith.constant 0 : i32
    %c0_i32_1 = arith.constant 0 : i32
    return %c0_i32, %c0_i32_0 : i32, i32
  }
  func.func @transform_10(%arg0: i32, %arg1: i32) -> (i32, i32) {
    %c0_i32 = arith.constant 0 : i32
    %c0_i32_0 = arith.constant 0 : i32
    %c0_i32_1 = arith.constant 0 : i32
    return %c0_i32, %c0_i32_0 : i32, i32
  }
  func.func @transform_11(%arg0: i32, %arg1: i32) -> (i32, i32) {
    %c0_i32 = arith.constant 0 : i32
    %c0_i32_0 = arith.constant 0 : i32
    %c0_i32_1 = arith.constant 0 : i32
    return %c0_i32, %c0_i32_0 : i32, i32
  }
  func.func @transform_12(%arg0: i32, %arg1: i32) -> (i32, i32, i32) {
    %c0_i32 = arith.constant 0 : i32
    %c0_i32_0 = arith.constant 0 : i32
    return %arg0, %arg1, %c0_i32 : i32, i32, i32
  }
}

</mosaic_0001>

<bundles_post_ra>
// kernel: block_forward.2
= control target key start
LH: loop header
LB: loop body
LE: loop exit
PB: predicated region body
PF: predicated region fallthrough
CT: control target
= control target key end

     0   :  { %s500_s15 = smov 0   ;;  %s502_s16 = smov 0   ;;  %s552_s0 = inlined_call_operand.vmem [shape: f32[2,8,32], index: 0, kind: input, shape index: {}]   ;;  %s553_s1 = inlined_call_operand.vmem [shape: f32[1,32], index: 1, kind: input, shape index: {}]   ;;  %s554_s2 = inlined_call_operand.vmem [shape: f32[1,32], index: 2, kind: input, shape index: {}]   ;;  %s555_s3 = inlined_call_operand.vmem [shape: bf16[32,96], index: 3, kind: input, shape index: {}]   ;;  %s556_s4 = inlined_call_operand.vmem [shape: bf16[2,8,96], index: 4, kind: output, shape index: {}]  }
   0x1   :  { %s504_s17 = smov 0  }
   0x2 LB: > { %s26_s18 = sadd.s32 1, %s467_s16  ;;  %p398_p0 = scmp.ge.s32.totalorder %s471_s17, 1  ;;  %s471_s17 = sphi %s504_s17, %s14_s17   ;;  %s467_s16 = sphi %s502_s16, %s558_s16   ;;  %s463_s15 = sphi %s500_s15, %s557_s15  }
   0x3   : > { %p28_p1 = scmp.ge.s32.totalorder %s26_s18, 2  ;;  %p180_p2 = scmp.lt.s32.totalorder %s471_s17, 3 }
   0x5   : > { %s560_s18 = smov (%p28_p1, %s26_s18), 0  ;;  %p181_p3 = pnand %p398_p0, %p180_p2 }
   0x6   : > { %p210_p4 = scmp.lt.s32.totalorder (!%p181_p3), %s463_s15, 1  ;;  %vm228_vm0 = vcmask (!%p181_p3), 261120   ;;  %v445_v7 = vld [vmem:[%s555_s3] sm:$0xff] (!%p181_p3)   ;;  %v473_v8 = vmov (!%p181_p3), 0.0   ;;  %v446_v9 = vld [vmem:[%s555_s3 + $0x8] sm:$0xff] (!%p181_p3)   ;;  %vm474_vm1 = vmmov (!%p181_p3), 0  }
   0x7   : > { %184 = sbr.rel (%p181_p3) target bundleno = 548 (0x224), region = 36  ;;  %411 = vmatprep.subr.bf16.mxu0 (!%p181_p3), %v473_v8  ;;  %415 = vmatprep.mubr.msk.bf16.mxu0 (!%p181_p3), %vm474_vm1, %v473_v8  ;;  %v401_v14 = vld [vmem:[%s553_s1] ss:$0 sm:$0xff] (!%p181_p3)  ;;  %vm318_vm2 = vcmask (!%p181_p3), 781312  }
   0x8   : > { %412 = vmatpush3.bf16.msra.mxu0 (!%p181_p3), %v445_v7  ;;  %v402_v16 = vld [vmem:[%s554_s2] ss:$0 sm:$0xff] (!%p181_p3) }
   0x9   : > { %413 = vmatprep.subr.bf16.mxu0 (!%p181_p3), %v473_v8 }
   0xc   : > { %414 = vmatpush3.bf16.msra.mxu0 (!%p181_p3), %v446_v9 }
   0xe   : > { %s562_s15 = smov (!%p210_p4, %s463_s15), 1 }
   0xf   : > { %s399_s19 = sshll.u32 %s562_s15, 3  ;;  %s400_s5 = sshll.u32 %s562_s15, 2 }
  0x10   : > { %s216_s22 = scalar_lea.vmem %s552_s0, %s399_s19  ;;  %s223_s8 = scalar_lea.vmem %s556_s4, %s400_s5 }
  0x11   : > { %v225_v0 = vld [vmem:[%s216_s22] sm:$0xff] }
  0x12   : > { %v229_v1 = vsel %vm228_vm0, %v225_v0, 0.0 }
  0x13   : > { %230 = vadd.xlane.f32.xlu0 %v229_v1 }
  0xa0   : > { %v231_v2 = vpop.xlane.xlu0 %230 }
  0xa1   : > { %v233_v3 = vmul.f32 0.03125, %v231_v2 }
  0xa3   : > { %v234_v4 = vsub.f32 %v225_v0, %v233_v3 }
  0xa5   : > { %v235_v5 = vmul.f32 %v234_v4, %v234_v4 }
  0xa7   : > { %v236_v6 = vsel %vm228_vm0, %v235_v5, 0.0 }
  0xa8   : > { %237 = vadd.xlane.f32.xlu0 %v236_v6 }
 0x135   : > { %v238_v10 = vpop.xlane.xlu0 %237 }
 0x136   : > { %v239_v11 = vmul.f32 0.03125, %v238_v10 }
 0x138   : > { %v240_v12 = vadd.f32 1e-05, %v239_v11 }
 0x13a   : > { %447 = vrsqrt.f32 %v240_v12 }
 0x144   : > { %v448_v13 = vpop.eup %447 }
 0x145   : > { %v242_v15 = vmul.f32 %v448_v13, %v234_v4 }
 0x147   : > { %v249_v17 = vmul.f32 %v401_v14, %v242_v15 }
 0x149   : > { %v256_v18 = vadd.f32 %v402_v16, %v249_v17 }
 0x14b   : > { %v257_v19 = vpack.c.bf16 %v256_v18, %v256_v18 }
 0x14d   : > { %416 = vmatmul.mubr.msk.bf16.vlgmr.msra.gmra.mrb[0].mxu0 %vm228_vm0, %v257_v19 }
 0x220   : > { %v311_v20 = vpop.f32.mrb[0].mxu0 }
 0x221   : > { %v317_v21 = vpack.c.bf16 %v311_v20, %v311_v20  ;;  %v417_v22 = vpop.f32.mrb[1].mxu0 }
 0x222   : > { %v314_v23 = vpop.f32.mrb[2].mxu0 }
 0x223   : > { %319 = vst.msk [vmem:[%s223_s8] sm:$0xf] %vm318_vm2, %v317_v21  ;;  %v418_v24 = vpop.f32.mrb[3].mxu0 }
 0x224 PF: > { %s14_s17 = sadd.s32 1, %s471_s17   ;;  %s557_s15 = smov %s467_s16 }
 0x225   : > { %p11_p5 = scmp.ge.s32.totalorder %s14_s17, 4   ;;  %s558_s16 = smov %s560_s18 }
 0x227   :  { %13 = sbr.rel (!%p11_p5) target bundleno = 2 (0x2), region = 66 }

// kernel: block_forward.3
= control target key start
LH: loop header
LB: loop body
LE: loop exit
PB: predicated region body
PF: predicated region fallthrough
CT: control target
= control target key end

     0   :  { %s2191_s0 = inlined_call_operand.vmem [shape: f32[2,8,32], index: 0, kind: input, shape index: {}]   ;;  %s2192_s1 = inlined_call_operand.vmem [shape: bf16[2,4,8,8], index: 1, kind: input, shape index: {}]   ;;  %s2193_s2 = inlined_call_operand.vmem [shape: bf16[2,4,8,8], index: 2, kind: input, shape index: {}]   ;;  %s2194_s3 = inlined_call_operand.vmem [shape: bf16[2,4,8,8], index: 3, kind: input, shape index: {}]   ;;  %s2195_s4 = inlined_call_operand.vmem [shape: bf16[4,8,32], index: 4, kind: input, shape index: {}]   ;;  %s2196_s5 = inlined_call_operand.vmem [shape: f32[1,32], index: 5, kind: input, shape index: {}]   ;;  %s2197_s6 = inlined_call_operand.vmem [shape: f32[1,32], index: 6, kind: input, shape index: {}]   ;;  %s2198_s7 = inlined_call_operand.vmem [shape: f32[1,32], index: 7, kind: input, shape index: {}]   ;;  %s2199_s8 = inlined_call_operand.vmem [shape: bf16[32,128], index: 8, kind: input, shape index: {}]   ;;  %s2200_s9 = inlined_call_operand.vmem [shape: f32[1,128], index: 9, kind: input, shape index: {}]   ;;  %s2201_s10 = inlined_call_operand.vmem [shape: bf16[128,32], index: 10, kind: input, shape index: {}]   ;;  %s2202_s11 = inlined_call_operand.vmem [shape: f32[1,32], index: 11, kind: input, shape index: {}]   ;;  %s2203_s12 = inlined_call_operand.hbm [shape: f32[2,8,32], index: 12, kind: output, shape index: {}]  }
   0x1   :  { %2204 = sst [smem:[#allocation5_spill]] %s2191_s0 }
   0x2   :  { %2205 = sst [smem:[#allocation6_spill]] %s2192_s1 }
   0x3   :  { %2206 = sst [smem:[#allocation7_spill]] %s2193_s2 }
   0x4   :  { %17 = vsyncpa [#allocation3], 0 }
   0x5   :  { %19 = vsyncpa [#allocation3 + $0x1], 0  ;;  %s1909_s21 = smov 0   ;;  %s1911_s22 = smov 0  }
   0x6   :  { %s1913_s23 = smov 0   ;;  %s1915_s24 = smov 0  }
   0x7   :  { %s1917_s25 = smov 0   ;;  %s1919_s26 = smov 0  }
   0x8 LB: > { %s1490_s27 = sadd.s32 4294967295, %s1839_s26   ;;  %s1491_s28 = sadd.s32 4294967294, %s1839_s26   ;;  %s1839_s26 = sphi %s1919_s26, %s25_s26   ;;  %s1835_s25 = sphi %s1917_s25, %s2216_s25   ;;  %s1831_s24 = sphi %s1915_s24, %s2215_s24   ;;  %s1827_s23 = sphi %s1913_s23, %s2214_s23   ;;  %s1823_s22 = sphi %s1911_s22, %s2213_s22   ;;  %s1819_s21 = sphi %s1909_s21, %s2212_s21  }
   0x9   : > { %s37_s29 = sadd.s32 1, %s1835_s25  ;;  %s322_s30 = sadd.s32 1, %s1827_s23 }
   0xa   : > { %p39_p0 = scmp.ge.s32.totalorder %s37_s29, 2  ;;  %p332_p1 = scmp.ne.s32.totalorder %s1827_s23, %s1823_s22 }
   0xb   : > { %p333_p2 = scmp.eq.s32.totalorder %s1490_s27, 1  ;;  %p338_p3 = scmp.ne.s32.totalorder %s1823_s22, %s1819_s21 }
   0xc   : > { %s2218_s29 = smov (%p39_p0, %s37_s29), 0  ;;  %p339_p5 = scmp.eq.s32.totalorder %s1491_s28, 1 }
   0xd   : > { %p1949_p4 = por %p333_p2, %p332_p1  ;;  %s317_s14 = ssub.s32 %s1835_s25, %s2218_s29 }
   0xe   : > { %p1494_p6 = scmp.ge.s32.totalorder %s1839_s26, 1  ;;  %p320_p7 = scmp.eq.s32.totalorder %s317_s14, 0 }
   0xf   : > { %p1956_p8 = por %p339_p5, %p338_p3  ;;  %p418_p9 = scmp.lt.s32.totalorder %s1839_s26, 3 }
  0x10   : > { %s1962_s16 = scalar_select %p320_p7, %s1827_s23, %s322_s30  }
  0x11   : > { %p419_p10 = pnand %p1494_p6, %p418_p9 }
  0x12   : > { %p480_p11 = scmp.lt.s32.totalorder (!%p419_p10), %s1831_s24, 1  ;;  %v1841_v0 = vmov (!%p419_p10), 0.0   ;;  %vm1842_vm0 = vmmov (!%p419_p10), 0   ;;  %vm519_vm1 = vcmask (!%p419_p10), 64512   ;;  %s2209_s2 = sld [smem:[#allocation7_spill]] (!%p419_p10)  ;;  %vm755_vm2 = vcmask (!%p419_p10), 1043456  }
  0x13   : > { %422 = sbr.rel (%p419_p10) target bundleno = 1798 (0x706), region = 68  ;;  %1574 = vmatprep.subr.bf16.mxu0 (!%p419_p10), %v1841_v0  ;;  %1576 = vmatprep.mubr.msk.bf16.mxu0 (!%p419_p10), %vm1842_vm0, %v1841_v0  ;;  %s2210_s1 = sld [smem:[#allocation6_spill]] (!%p419_p10)  ;;  %vm1129_vm3 = vcmask (!%p419_p10), 261120  }
  0x14   : > { %1592 = vmatprep.subr.bf16.mxu1 (!%p419_p10), %v1841_v0  ;;  %1594 = vmatprep.mubr.msk.bf16.mxu1 (!%p419_p10), %vm1842_vm0, %v1841_v0  ;;  %s2211_s0 = sld [smem:[#allocation5_spill]] (!%p419_p10)  ;;  %s1532_s20 = sshll.u32 (!%p419_p10), %s1831_s24, 7 }
  0x1a   : > { %s1969_s17 = scalar_select %p480_p11, %s1831_s24, 1 }
  0x1c   : > { %s1975_s18 = sshll.u32 %s1969_s17, 4  ;;  %s1496_s28 = sshll.u32 %s1969_s17, 3 }
  0x1d   : > { %s499_s27 = scalar_lea.vmem %s2209_s2, %s1975_s18  ;;  %s494_s14 = scalar_lea.vmem %s2210_s1, %s1975_s18 }
  0x1e   : > { %v511_v1 = vld [vmem:[%s499_s27] sm:$0xf]  ;;  %v514_v3 = vld [vmem:[%s499_s27 + $0xc] sm:$0xf]  ;;  %v512_v4 = vld [vmem:[%s499_s27 + $0x4] sm:$0xf]  ;;  %s486_s19 = scalar_lea.vmem %s2211_s0, %s1496_s28  ;;  %s2143_s1 = scalar_lea.hbm %s2203_s12, %s1532_s20 }
  0x1f   : > { %v524_v2 = vsel %vm519_vm1, %v511_v1, 0  ;;  %v662_v5 = vsel %vm519_vm1, %v514_v3, 0  ;;  %v507_v6 = vld [vmem:[%s494_s14] sm:$0xf]  ;;  %v570_v7 = vsel %vm519_vm1, %v512_v4, 0  ;;  %s477_s28 = sand.u32 1, %s1823_s22  }
  0x20   : > { %1575 = vmatpush3.bf16.xpose.msra.mxu0 %v524_v2  ;;  %1593 = vmatpush3.bf16.xpose.msra.mxu1 %v662_v5  ;;  %v510_v8 = vld [vmem:[%s494_s14 + $0xc] sm:$0xf]  ;;  %v513_v9 = vld [vmem:[%s499_s27 + $0x8] sm:$0xf]  ;;  %v508_v10 = vld [vmem:[%s494_s14 + $0x4] sm:$0xf]  ;;  %s504_s27 = scalar_lea.vmem %s2194_s3, %s1975_s18 }
  0x21   : > { %1580 = vmatprep.subr.bf16.mxu0 %v1841_v0  ;;  %1604 = vmatprep.subr.bf16.mxu1 %v1841_v0  ;;  %v616_v11 = vsel %vm519_vm1, %v513_v9, 0  ;;  %v509_v12 = vld [vmem:[%s494_s14 + $0x8] sm:$0xf]  ;;  %v515_v53 = vld [vmem:[%s504_s27] sm:$0xf]  ;;  %s1495_s30 = sshll.u32 %s477_s28, 3 }
  0x22   : > { %v757_v54 = vsel %vm755_vm2, %v515_v53, 0  ;;  %v516_v55 = vld [vmem:[%s504_s27 + $0x4] sm:$0xf]  ;;  %v517_v60 = vld [vmem:[%s504_s27 + $0x8] sm:$0xf]  ;;  %s1363_s24 = scalar_lea.sflag [#allocation3], %s477_s28 }
  0x23   : > { %v803_v56 = vsel %vm755_vm2, %v516_v55, 0  ;;  %v849_v63 = vsel %vm755_vm2, %v517_v60, 0  ;;  %v518_v3 = vld [vmem:[%s504_s27 + $0xc] sm:$0xf]  ;;  %s479_s27 = scalar_lea.vmem [#allocation2], %s1495_s30  ;;  %s1843_s14 = smov [#allocation2]  }
  0x24   : > { %s1377_s17 = sshll.u32 %s479_s27, 4  ;;  %s2145_s17 = int_to_ptr.vmem [resolvable:$true] %s1377_s17 }
  0x25   : > { %s1761_s30 = scalar_lea.vmem %s2145_s17, 128 }
  0x26   : > { %p1762_p12 = scmp.ne.s32.totalorder %s2145_s17, %s1761_s30 }
  0x27   : > { %1577 = vmatmul.mubr.msk.bf16.vlgmr.msra.gmra.mrb[0].mxu0 %vm519_vm1, %v507_v6  ;;  %1595 = vmatmul.mubr.msk.bf16.vlgmr.msra.gmra.mrb[0].mxu1 %vm519_vm1, %v510_v8 }
  0x28   : > { %1581 = vmatpush3.bf16.xpose.msra.mxu0 %v570_v7  ;;  %1582 = vmatprep.mubr.msk.bf16.mxu0 %vm1842_vm0, %v1841_v0  ;;  %v895_v7 = vsel %vm755_vm2, %v518_v3, 0  ;;  %v506_v3 = vld [vmem:[%s486_s19] sm:$0xff]  ;;  %p1763_p13 = pnand %p1762_p12, %p1949_p4  ;;  %s1765_s19 = sshll.u32 %s1843_s14, 4  ;;  %s1766_s19 = int_to_ptr.vmem [resolvable:$false] %s1765_s19 }
  0x29   : > { %1586 = vmatprep.subr.bf16.mxu0 %v1841_v0  ;;  %1606 = vmatprep.mubr.msk.bf16.mxu1 %vm1842_vm0, %v1841_v0  ;;  %s1767_s2 = scalar_lea.vmem %s1766_s19, 256  ;;  %p1768_p1 = scmp.lt.s32.totalorder %s2145_s17, %s1766_s19 }
  0x2a   : > { %1605 = vmatpush3.bf16.msra.mxu1 %v803_v56  ;;  %p1764_p0 = pneg %p1763_p13  ;;  %p1769_p2 = scmp.lt.s32.totalorder %s1767_s2, %s1761_s30 }
  0x2b   : > { %1616 = vmatprep.subr.bf16.mxu1 %v1841_v0 }
  0x2c   : > { %p1770_p3 = por %p1769_p2, %p1768_p1 }
  0x2e   : > { %p1771_p5 = pnand %p1770_p3, %p1764_p0 }
  0x2f   : > { %1583 = vmatmul.mubr.msk.bf16.vlgmr.msra.gmra.mrb[4].mxu0 %vm519_vm1, %v508_v10 }
  0x30   : > { %1587 = vmatpush3.bf16.xpose.msra.mxu0 %v616_v11  ;;  %1588 = vmatprep.mubr.msk.bf16.mxu0 %vm1842_vm0, %v1841_v0 }
  0x31   : > { %1598 = vmatprep.subr.bf16.mxu0 %v1841_v0 }
  0x37   : > { %1589 = vmatmul.mubr.msk.bf16.vlgmr.msra.gmra.mrb[8].mxu0 %vm519_vm1, %v509_v12 }
  0x38   : > { %1600 = vmatprep.mubr.msk.bf16.mxu0 %vm1842_vm0, %v1841_v0  ;;  %1599 = vmatpush3.bf16.msra.mxu0 %v757_v54 }
  0x39   : > { %1610 = vmatprep.subr.bf16.mxu0 %v1841_v0 }
  0xfa   : > { %v560_v13 = vpop.f32.mrb[0].mxu0  ;;  %v698_v17 = vpop.f32.mrb[0].mxu1 }
  0xfb   : > { %v1578_v14 = vpop.f32.mrb[1].mxu0  ;;  %v704_v15 = vsel %vm519_vm1, %v560_v13, -inf  ;;  %v1596_v19 = vpop.f32.mrb[1].mxu1  ;;  %v713_v32 = vsel %vm519_vm1, %v698_v17, -inf }
  0xfc   : > { %705 = vmax.xlane.f32.xlu0 %v704_v15  ;;  %v563_v16 = vpop.f32.mrb[2].mxu0  ;;  %v701_v20 = vpop.f32.mrb[2].mxu1  ;;  %v941_v14 = vld [vmem:[%s2195_s4] sm:$0xf] }
  0xfd   : > { %v1579_v18 = vpop.f32.mrb[3].mxu0  ;;  %v1597_v21 = vpop.f32.mrb[3].mxu1  ;;  %v949_v15 = vsel %vm755_vm2, %v941_v14, 0  ;;  %v942_v16 = vld [vmem:[%s2195_s4 + $0x4] sm:$0xf] }
  0xfe   : > { %v943_v18 = vld [vmem:[%s2195_s4 + $0x8] sm:$0xf]  ;;  %v1733_v14 = vld [vmem:[%s2201_s10] sm:$0xff]  }
 0x102   : > { %v606_v22 = vpop.f32.mrb[4].mxu0 }
 0x103   : > { %v1584_v23 = vpop.f32.mrb[5].mxu0  ;;  %v707_v24 = vsel %vm519_vm1, %v606_v22, -inf }
 0x104   : > { %708 = vmax.xlane.f32.xlu0 %v707_v24  ;;  %v609_v25 = vpop.f32.mrb[6].mxu0 }
 0x105   : > { %v1585_v26 = vpop.f32.mrb[7].mxu0  ;;  %v944_v25 = vld [vmem:[%s2195_s4 + $0xc] sm:$0xf] }
 0x10a   : > { %v652_v27 = vpop.f32.mrb[8].mxu0 }
 0x10b   : > { %v1590_v28 = vpop.f32.mrb[9].mxu0  ;;  %v710_v29 = vsel %vm519_vm1, %v652_v27, -inf }
 0x10c   : > { %711 = vmax.xlane.f32.xlu1 %v710_v29  ;;  %v655_v30 = vpop.f32.mrb[10].mxu0  ;;  %v1087_v29 = vsel %vm755_vm2, %v944_v25, 0 }
 0x10d   : > { %v1591_v31 = vpop.f32.mrb[11].mxu0 }
 0x110   : > { %714 = vmax.xlane.f32.xlu1 %v713_v32 }
 0x189   : > { %v706_v33 = vpop.xlane.xlu0 %705 }
 0x18a   : > { %v716_v34 = vsub.f32 %v560_v13, %v706_v33 }
 0x18c   : > { %v720_v35 = vmul.f32 1.442695, %v716_v34 }
 0x18e   : > { %1741 = vpow2.f32 %v720_v35 }
 0x191   : > { %v709_v36 = vpop.xlane.xlu0 %708 }
 0x192   : > { %v717_v37 = vsub.f32 %v606_v22, %v709_v36  ;;  %v1041_v22 = vsel %vm755_vm2, %v943_v18, 0 }
 0x194   : > { %v722_v38 = vmul.f32 1.442695, %v717_v37 }
 0x196   : > { %1743 = vpow2.f32 %v722_v38 }
 0x198   : > { %v1742_v39 = vpop.eup %1741 }
 0x199   : > { %v712_v40 = vpop.xlane.xlu1 %711  ;;  %v728_v41 = vsel %vm519_vm1, %v1742_v39, 0.0 }
 0x19a   : > { %v718_v42 = vsub.f32 %v652_v27, %v712_v40  ;;  %729 = vadd.xlane.f32.xlu0 %v728_v41 }
 0x19c   : > { %v724_v43 = vmul.f32 1.442695, %v718_v42 }
 0x19d   : > { %v715_v44 = vpop.xlane.xlu1 %714 }
 0x19e   : > { %1745 = vpow2.f32 %v724_v43  ;;  %v719_v45 = vsub.f32 %v698_v17, %v715_v44  ;;  %v995_v17 = vsel %vm755_vm2, %v942_v16, 0  ;;  %v1735_v16 = vld [vmem:[%s2201_s10 + $0x10] sm:$0xff]  }
 0x1a0   : > { %v1744_v46 = vpop.eup %1743  ;;  %v726_v47 = vmul.f32 1.442695, %v719_v45 }
 0x1a1   : > { %v731_v48 = vsel %vm519_vm1, %v1744_v46, 0.0 }
 0x1a2   : > { %1747 = vpow2.f32 %v726_v47  ;;  %732 = vadd.xlane.f32.xlu1 %v731_v48 }
 0x1a8   : > { %v1746_v49 = vpop.eup %1745 }
 0x1a9   : > { %v734_v50 = vsel %vm519_vm1, %v1746_v49, 0.0 }
 0x1aa   : > { %735 = vadd.xlane.f32.xlu0 %v734_v50 }
 0x1ac   : > { %v1748_v51 = vpop.eup %1747 }
 0x1ad   : > { %v737_v52 = vsel %vm519_vm1, %v1748_v51, 0.0 }
 0x1ae   : > { %738 = vadd.xlane.f32.xlu1 %v737_v52 }
 0x227   : > { %v730_v57 = vpop.xlane.xlu0 %729 }
 0x228   : > { %1749 = vrcp.f32 %v730_v57 }
 0x22f   : > { %v733_v58 = vpop.xlane.xlu1 %732 }
 0x230   : > { %1751 = vrcp.f32 %v733_v58 }
 0x232   : > { %v1750_v59 = vpop.eup %1749 }
 0x233   : > { %v744_v61 = vmul.f32 %v1750_v59, %v1742_v39 }
 0x235   : > { %v748_v62 = vpack.c.bf16 %v744_v61, %v744_v61  ;;  %v1515_v61 = vld [vmem:[%s2196_s5] ss:$0 sm:$0xff] }
 0x237   : > { %1601 = vmatmul.mubr.msk.bf16.vlgmr.msra.gmra.mrb[12].mxu0 %vm519_vm1, %v748_v62  ;;  %v736_v1 = vpop.xlane.xlu0 %735 }
 0x238   : > { %1753 = vrcp.f32 %v736_v1  ;;  %1611 = vmatpush3.bf16.msra.mxu0 %v849_v63  ;;  %1612 = vmatprep.mubr.msk.bf16.mxu0 %vm1842_vm0, %v1841_v0 }
 0x239   : > { %1622 = vmatprep.subr.bf16.mxu0 %v1841_v0 }
 0x23a   : > { %v1752_v2 = vpop.eup %1751 }
 0x23b   : > { %v745_v4 = vmul.f32 %v1752_v2, %v1744_v46  ;;  %v739_v5 = vpop.xlane.xlu1 %738 }
 0x23c   : > { %1755 = vrcp.f32 %v739_v5 }
 0x23d   : > { %v749_v6 = vpack.c.bf16 %v745_v4, %v745_v4 }
 0x23f   : > { %1607 = vmatmul.mubr.msk.bf16.vlgmr.msra.gmra.mrb[4].mxu1 %vm519_vm1, %v749_v6 }
 0x240   : > { %1617 = vmatpush3.bf16.msra.mxu1 %v895_v7  ;;  %1618 = vmatprep.mubr.msk.bf16.mxu1 %vm1842_vm0, %v1841_v0 }
 0x241   : > { %1628 = vmatprep.subr.bf16.mxu1 %v1841_v0 }
 0x242   : > { %v1754_v8 = vpop.eup %1753 }
 0x243   : > { %v746_v9 = vmul.f32 %v1754_v8, %v1746_v49 }
 0x245   : > { %v750_v10 = vpack.c.bf16 %v746_v9, %v746_v9 }
 0x246   : > { %v1756_v11 = vpop.eup %1755 }
 0x247   : > { %v747_v12 = vmul.f32 %v1756_v11, %v1748_v51  ;;  %1613 = vmatmul.mubr.msk.bf16.vlgmr.msra.gmra.mrb[16].mxu0 %vm519_vm1, %v750_v10 }
 0x248   : > { %1624 = vmatprep.mubr.msk.bf16.mxu0 %vm1842_vm0, %v1841_v0  ;;  %1623 = vmatpush3.bf16.msra.mxu0 %v949_v15  ;;  %v1734_v15 = vld [vmem:[%s2201_s10 + $0x8] sm:$0xff]  }
 0x249   : > { %v751_v13 = vpack.c.bf16 %v747_v12, %v747_v12  ;;  %1634 = vmatprep.subr.bf16.mxu0 %v1841_v0  ;;  %v1731_v12 = vld [vmem:[%s2199_s8] sm:$0xff]  }
 0x24b   : > { %1619 = vmatmul.mubr.msk.bf16.vlgmr.msra.gmra.mrb[8].mxu1 %vm519_vm1, %v751_v13  ;;  %v1732_v13 = vld [vmem:[%s2199_s8 + $0x8] sm:$0xff]  }
 0x24c   : > { %1630 = vmatprep.mubr.msk.bf16.mxu1 %vm1842_vm0, %v1841_v0  ;;  %1629 = vmatpush3.bf16.msra.mxu1 %v995_v17 }
 0x24d   : > { %1640 = vmatprep.subr.bf16.mxu1 %v1841_v0 }
 0x30a   : > { %v793_v19 = vpop.f32.mrb[12].mxu0 }
 0x30b   : > { %v937_v20 = vpack.c.bf16 %v793_v19, %v793_v19  ;;  %v1602_v21 = vpop.f32.mrb[13].mxu0 }
 0x30c   : > { %v796_v23 = vpop.f32.mrb[14].mxu0  ;;  %v1516_v21 = vld [vmem:[%s2197_s6] ss:$0 sm:$0xff] }
 0x30d   : > { %v1603_v24 = vpop.f32.mrb[15].mxu0  ;;  %1625 = vmatmul.mubr.msk.bf16.vlgmr.msra.gmra.mrb[20].mxu0 %vm519_vm1, %v937_v20  ;;  %v1517_v23 = vld [vmem:[%s2198_s7] ss:$0 sm:$0xff] }
 0x30e   : > { %1635 = vmatpush3.bf16.msra.mxu0 %v1041_v22  ;;  %1636 = vmatprep.mubr.msk.bf16.mxu0 %vm1842_vm0, %v1841_v0 }
 0x30f   : > { %1646 = vmatprep.subr.bf16.mxu0 %v1841_v0 }
 0x312   : > { %v839_v26 = vpop.f32.mrb[4].mxu1 }
 0x313   : > { %v938_v27 = vpack.c.bf16 %v839_v26, %v839_v26  ;;  %v1608_v28 = vpop.f32.mrb[5].mxu1 }
 0x314   : > { %v842_v30 = vpop.f32.mrb[6].mxu1  ;;  %v1737_v28 = vld [vmem:[%s2201_s10 + $0x20] sm:$0xff]  }
 0x315   : > { %v1609_v31 = vpop.f32.mrb[7].mxu1  ;;  %1631 = vmatmul.mubr.msk.bf16.vlgmr.msra.gmra.mrb[12].mxu1 %vm519_vm1, %v938_v27  ;;  %v1736_v27 = vld [vmem:[%s2201_s10 + $0x18] sm:$0xff]   ;;  %v1739_v30 = vld [vmem:[%s2201_s10 + $0x30] sm:$0xff]  }
 0x316   : > { %1641 = vmatpush3.bf16.msra.mxu1 %v1087_v29  ;;  %1642 = vmatprep.mubr.msk.bf16.mxu1 %vm1842_vm0, %v1841_v0  ;;  %v1738_v29 = vld [vmem:[%s2201_s10 + $0x28] sm:$0xff]   ;;  %v1740_v31 = vld [vmem:[%s2201_s10 + $0x38] sm:$0xff]  }
 0x317   : > { %1654 = vmatprep.subr.bf16.mxu1 %v1841_v0 }
 0x31a   : > { %v885_v32 = vpop.f32.mrb[16].mxu0 }
 0x31b   : > { %v939_v33 = vpack.c.bf16 %v885_v32, %v885_v32  ;;  %v1614_v34 = vpop.f32.mrb[17].mxu0  ;;  %v1518_v32 = vld [vmem:[%s2200_s9] ss:$0 sm:$0xff] }
 0x31c   : > { %v888_v35 = vpop.f32.mrb[18].mxu0 }
 0x31d   : > { %v1615_v36 = vpop.f32.mrb[19].mxu0  ;;  %1637 = vmatmul.mubr.msk.bf16.vlgmr.msra.gmra.mrb[24].mxu0 %vm519_vm1, %v939_v33 }
 0x31e   : > { %v931_v37 = vpop.f32.mrb[8].mxu1  ;;  %1650 = vmatprep.mubr.msk.bf16.mxu0 %vm1842_vm0, %v1841_v0  ;;  %1647 = vmatpush3.bf16.msra.mxu0 %v1731_v12 }
 0x31f   : > { %v940_v38 = vpack.c.bf16 %v931_v37, %v931_v37  ;;  %v1620_v39 = vpop.f32.mrb[9].mxu1  ;;  %1648 = vmatprep.subr.bf16.mxu0 %v1841_v0 }
 0x320   : > { %v934_v40 = vpop.f32.mrb[10].mxu1 }
 0x321   : > { %v1621_v41 = vpop.f32.mrb[11].mxu1  ;;  %1643 = vmatmul.mubr.msk.bf16.vlgmr.msra.gmra.mrb[16].mxu1 %vm519_vm1, %v940_v38 }
 0x322   : > { %1670 = vmatprep.mubr.msk.bf16.mxu1 %vm1842_vm0, %v1841_v0  ;;  %1649 = vmatpush3.bf16.msra.mxu0 %v1732_v13 }
 0x323   : > { %1655 = vmatpush3.bf16.msra.mxu1 %v1733_v14 }
 0x324   : > { %1656 = vmatprep.subr.bf16.mxu1 %v1841_v0 }
 0x327   : > { %1657 = vmatpush3.bf16.msra.mxu1 %v1734_v15 }
 0x328   : > { %1658 = vmatprep.subr.bf16.mxu1 %v1841_v0 }
 0x32b   : > { %1659 = vmatpush3.bf16.msra.mxu1 %v1735_v16 }
 0x32c   : > { %1660 = vmatprep.subr.bf16.mxu1 %v1841_v0 }
 0x32f   : > { %1661 = vmatpush3.bf16.msra.mxu1 %v1736_v27 }
 0x330   : > { %1662 = vmatprep.subr.bf16.mxu1 %v1841_v0 }
 0x333   : > { %1663 = vmatpush3.bf16.msra.mxu1 %v1737_v28 }
 0x334   : > { %1664 = vmatprep.subr.bf16.mxu1 %v1841_v0 }
 0x337   : > { %1665 = vmatpush3.bf16.msra.mxu1 %v1738_v29 }
 0x338   : > { %1666 = vmatprep.subr.bf16.mxu1 %v1841_v0 }
 0x33b   : > { %1667 = vmatpush3.bf16.msra.mxu1 %v1739_v30 }
 0x33c   : > { %1668 = vmatprep.subr.bf16.mxu1 %v1841_v0 }
 0x33f   : > { %1669 = vmatpush3.bf16.msra.mxu1 %v1740_v31 }
 0x3e0   : > { %v985_v42 = vpop.f32.mrb[20].mxu0 }
 0x3e1   : > { %v1626_v43 = vpop.f32.mrb[21].mxu0  ;;  %v1130_v47 = vsel %vm1129_vm3, %v985_v42, 0.0 }
 0x3e2   : > { %v988_v44 = vpop.f32.mrb[22].mxu0  ;;  %v1522_v43 = vld [vmem:[%s2202_s11] ss:$0 sm:$0xff] }
 0x3e3   : > { %v1627_v45 = vpop.f32.mrb[23].mxu0 }
 0x3e8   : > { %v1031_v46 = vpop.f32.mrb[12].mxu1 }
 0x3e9   : > { %v1131_v48 = vsel %vm1129_vm3, %v1031_v46, 0.0  ;;  %v1632_v49 = vpop.f32.mrb[13].mxu1 }
 0x3ea   : > { %v1132_v50 = vadd.f32 %v1131_v48, %v1130_v47  ;;  %v1034_v51 = vpop.f32.mrb[14].mxu1 }
 0x3eb   : > { %v1633_v52 = vpop.f32.mrb[15].mxu1 }
 0x3f0   : > { %v1077_v53 = vpop.f32.mrb[24].mxu0 }
 0x3f1   : > { %v1133_v54 = vsel %vm1129_vm3, %v1077_v53, 0.0  ;;  %v1638_v55 = vpop.f32.mrb[25].mxu0 }
 0x3f2   : > { %v1134_v56 = vadd.f32 %v1133_v54, %v1132_v50  ;;  %v1080_v57 = vpop.f32.mrb[26].mxu0 }
 0x3f3   : > { %v1639_v58 = vpop.f32.mrb[27].mxu0 }
 0x3f4   : > { %v1123_v59 = vpop.f32.mrb[16].mxu1 }
 0x3f5   : > { %v1135_v60 = vsel %vm1129_vm3, %v1123_v59, 0.0  ;;  %v1644_v62 = vpop.f32.mrb[17].mxu1 }
 0x3f6   : > { %v1136_v63 = vadd.f32 %v1135_v60, %v1134_v56  ;;  %v1126_v1 = vpop.f32.mrb[18].mxu1 }
 0x3f7   : > { %v1645_v2 = vpop.f32.mrb[19].mxu1 }
 0x3f8   : > { %v1144_v4 = vadd.f32 %v1515_v61, %v1136_v63 }
 0x3fa   : > { %v2080_v5 = vadd.f32 %v1144_v4, %v506_v3 }
 0x3fc   : > { %v1148_v6 = vsel %vm1129_vm3, %v2080_v5, 0.0 }
 0x3fd   : > { %1149 = vadd.xlane.f32.xlu0 %v1148_v6 }
 0x48a   : > { %v1150_v7 = vpop.xlane.xlu0 %1149 }
 0x48b   : > { %v1152_v8 = vmul.f32 0.03125, %v1150_v7 }
 0x48d   : > { %v1153_v9 = vsub.f32 %v2080_v5, %v1152_v8 }
 0x48f   : > { %v1154_v10 = vmul.f32 %v1153_v9, %v1153_v9 }
 0x491   : > { %v1155_v11 = vsel %vm1129_vm3, %v1154_v10, 0.0 }
 0x492   : > { %1156 = vadd.xlane.f32.xlu1 %v1155_v11 }
 0x51f   : > { %v1157_v17 = vpop.xlane.xlu1 %1156 }
 0x520   : > { %v1158_v18 = vmul.f32 0.03125, %v1157_v17 }
 0x522   : > { %v1159_v19 = vadd.f32 1e-05, %v1158_v18 }
 0x524   : > { %1757 = vrsqrt.f32 %v1159_v19 }
 0x52e   : > { %v1758_v20 = vpop.eup %1757 }
 0x52f   : > { %v1161_v22 = vmul.f32 %v1758_v20, %v1153_v9 }
 0x531   : > { %v1168_v24 = vmul.f32 %v1516_v21, %v1161_v22 }
 0x533   : > { %v1175_v25 = vadd.f32 %v1517_v23, %v1168_v24 }
 0x535   : > { %v1176_v26 = vpack.c.bf16 %v1175_v25, %v1175_v25 }
 0x537   : > { %1651 = vmatmul.mubr.msk.bf16.vlgmr.msra.gmra.mrb[28].mxu0 %vm1129_vm3, %v1176_v26 }
 0x60a   : > { %v1237_v33 = vpop.f32.mrb[28].mxu0 }
 0x60b   : > { %v1238_v34 = vadd.f32 %v1518_v32, %v1237_v33  ;;  %v1652_v35 = vpop.f32.mrb[29].mxu0 }
 0x60c   : > { %v1240_v36 = vpop.f32.mrb[30].mxu0 }
 0x60d   : > { %v1244_v37 = vmul.f32 0.70710677, %v1238_v34  ;;  %v1653_v38 = vpop.f32.mrb[31].mxu0  ;;  %v1243_v0 = vmul.f32 0.5, %v1238_v34 }
 0x60f   : > { %1759 = verf.f32 %v1244_v37 }
 0x619   : > { %v1760_v39 = vpop.eup %1759 }
 0x61a   : > { %v1246_v40 = vadd.f32 1.0, %v1760_v39 }
 0x61c   : > { %v1247_v41 = vmul.f32 %v1246_v40, %v1243_v0 }
 0x61e   : > { %v1248_v42 = vpack.c.bf16 %v1247_v41, %v1247_v41 }
 0x620   : > { %1671 = vmatmul.mubr.bf16.vlgmr.msra.gmra.mrb[20].mxu1 %v1248_v42 }
 0x6f3   : > { %v1354_v44 = vpop.f32.mrb[20].mxu1 }
 0x6f4   : > { %v1355_v45 = vadd.f32 %v1522_v43, %v1354_v44  ;;  %v1672_v46 = vpop.f32.mrb[21].mxu1 }
 0x6f5   : > { %v1357_v47 = vpop.f32.mrb[22].mxu1 }
 0x6f6   : > { %v1360_v48 = vadd.f32 %v1355_v45, %v2080_v5  ;;  %v1673_v49 = vpop.f32.mrb[23].mxu1 }
 0x6f8   : > { %1361 = vst.msk [vmem:[%s479_s27] sm:$0xff] %vm1129_vm3, %v1360_v48 }
 0x6f9   : > { %1774 = shalt.err (!%p1771_p5)
}
 0x6fa   : > { %s1775_s0 = scalar_lea.hbm %s2143_s1, 128  ;;  %s1779_s27 = scalar_lea.hbm %s2203_s12, 256 }
 0x6fb   : > { %p1776_p6 = scmp.ne.s32.totalorder %s2143_s1, %s1775_s0  ;;  %p1780_p10 = scmp.lt.u32.totalorder %s2143_s1, %s2203_s12 }
 0x6fc   : > { %p1781_p11 = scmp.lt.u32.totalorder %s1779_s27, %s1775_s0  ;;  %p1783_p13 = scmp.lt.u32.totalorder %s1775_s0, %s2143_s1 }
 0x6fd   : > { %p1777_p7 = pnand %p1776_p6, %p1949_p4 }
 0x6fe   : > { %p1782_p12 = por %p1781_p11, %p1780_p10 }
 0x6ff   : > { %p1778_p9 = pneg %p1777_p7 }
 0x700   : > { %p1784_p0 = por %p1783_p13, %p1782_p12 }
 0x702   : > { %p1785_p1 = pnand %p1784_p0, %p1778_p9 }
 0x704   : > { %1788 = shalt.err (!%p1785_p1)
}
 0x705   : > { %1674 = dma.vmem_to_hbm [thread:$0]  (%p1949_p4), %s2145_s17, 128, %s2143_s1, %s1363_s24  }
 0x706 PF: > { %p1680_p2 = scmp.ge.s32.totalorder %s1839_s26, 2  ;;  %s1389_s2 = sand.u32 1, %s1819_s21  }
 0x707   : > { %s1390_s30 = scalar_lea.sflag [#allocation3], %s1389_s2 }
 0x708   : > { %p1677_p3 = pnand %p1680_p2, %p1956_p8 }
 0x70a   : > { %1814 = dma.done.wait (!%p1677_p3), %s1390_s30, 128  }
 0x70b   : > { %1816 = vsyncadd (!%p1677_p3), %s1390_s30, 4294967168  ;;  %s25_s26 = sadd.s32 1, %s1839_s26   ;;  %s2212_s21 = smov %s1823_s22 }
 0x70c   : > { %p22_p5 = scmp.ge.s32.totalorder %s25_s26, 4   ;;  %s2213_s22 = smov %s1827_s23 }
 0x70d   : > { %s2214_s23 = smov %s1962_s16  ;;  %s2215_s24 = smov %s1835_s25 }
 0x70e   : > { %s2216_s25 = smov %s2218_s29  ;;  %24 = sbr.rel (!%p22_p5) target bundleno = 8 (0x8), region = 112 }
 0x715   :  { %1395 = vsyncpa [#allocation3], 1 }
 0x716   :  { %1397 = vsyncpa [#allocation3 + $0x1], 1 }

</bundles_post_ra>
